<compile_context>
chip_gen: v7x
topology: tpu7x:2x2x1
jax: 0.10.0
libtpu: 0.0.40
codegen_flags: <defaults>
</compile_context>

<pallas_src>
import jax
import jax.numpy as jnp
from jax.experimental import pallas as pl
from jax.experimental.pallas import tpu as pltpu

EPS = 1e-5


def _round_up(x, m):
    return ((x + m - 1) // m) * m


def prenorm_linear_kernel(x_ref, gamma_ref, beta_ref, w_ref, b_ref, o_ref, y_ref):
    # LayerNorm (f32 statistics) runs once per row tile -- only at the first
    # D_out tile -- and the normalized rows are cached in VMEM (y_ref, already
    # cast to the MXU feed dtype) and reused for all later j tiles.
    @pl.when(pl.program_id(1) == 0)
    def _():
        x = x_ref[...].astype(jnp.float32)                       # (TM, D)
        mean = jnp.mean(x, axis=-1, keepdims=True)
        centered = x - mean
        var = jnp.mean(centered * centered, axis=-1, keepdims=True)
        xn = centered * jax.lax.rsqrt(var + EPS)
        y = xn * gamma_ref[...].astype(jnp.float32) + beta_ref[...].astype(jnp.float32)
        y_ref[...] = y.astype(y_ref.dtype)

    # fn = Linear(D, D_out): MXU matmul in the weight dtype, f32 accumulation.
    out = jnp.dot(y_ref[...], w_ref[...], preferred_element_type=jnp.float32)
    o_ref[...] = (out + b_ref[...].astype(jnp.float32)).astype(o_ref.dtype)


def prenorm_linear(x, gamma, beta, w, b, *, tm=512, tn=256):
    """x: (B, N, D); gamma/beta: (D,); w: (D, D_out); b: (D_out,)."""
    B, N, D = x.shape
    D_out = w.shape[1]
    R = B * N

    x2 = x.reshape(R, D)
    gamma2 = gamma.reshape(1, D)
    beta2 = beta.reshape(1, D)
    b2 = b.reshape(1, D_out)

    # ---- D_out (lane) tiling: minimal 128-granule padding, tn divides it ----
    if D_out <= 128:
        tn = D_out                       # single full-width block (always legal)
    else:
        tn = max(128, (tn // 128) * 128)
        dout128 = _round_up(D_out, 128)
        tn = min(tn, dout128)
        if dout128 % tn != 0:
            tn = 128                     # avoid over-padding ragged D_out

    # ---- Row (sublane) tiling: multiple of 8, clamped to the problem, and
    # ---- capped so grid[0] >= 2 (both v7x TensorCores get row tiles). ----
    if R <= 8:
        tm = R                           # single full-height block
    else:
        tm = min(tm, _round_up(R, 8))
        tm = max(8, min(tm, _round_up(-(-R // 2), 8)))

    # ---- VMEM budget (double-buffered pipeline tiles + LN scratch). ----
    x_sz = x2.dtype.itemsize
    w_sz = w.dtype.itemsize
    b_sz = b.dtype.itemsize

    def footprint(tm_, tn_):
        return (2 * tm_ * D * x_sz           # x tiles (double-buffered)
                + tm_ * D * w_sz             # normalized-row scratch
                + 2 * D * tn_ * w_sz         # W column tiles
                + 2 * tm_ * tn_ * x_sz       # output tiles
                + 4 * D * 4                  # gamma + beta
                + 2 * tn_ * b_sz)            # bias tiles

    try:
        vmem_cap = int(pltpu.get_tpu_info().vmem_capacity_bytes)
    except Exception:
        vmem_cap = 64 << 20                  # conservative: v7x has 64 MiB/TC
    budget = (vmem_cap * 7) // 8             # leave headroom for the compiler
    while footprint(tm, tn) > budget and tm > 8:
        tm = max(8, _round_up(tm // 2, 8))
    vmem_limit = int(min(budget, max(footprint(tm, tn) * 5 // 4, 16 << 20)))

    grid = (pl.cdiv(R, tm), pl.cdiv(D_out, tn))

    cost = pl.CostEstimate(
        flops=int(2 * R * D * D_out),
        transcendentals=int(R),                         # one rsqrt per row (LN hoisted)
        bytes_accessed=int(x2.size * x_sz               # x read once (j-invariant block)
                           + w.size * w_sz * grid[0]    # W re-streamed per row tile
                           + R * D_out * x_sz),         # output written once
    )

    out2 = pl.pallas_call(
        prenorm_linear_kernel,
        out_shape=jax.ShapeDtypeStruct((R, D_out), x.dtype),
        grid_spec=pltpu.PrefetchScalarGridSpec(
            num_scalar_prefetch=0,
            grid=grid,
            in_specs=[
                pl.BlockSpec((tm, D), lambda i, j: (i, 0)),    # x rows (resident over j)
                pl.BlockSpec((1, D), lambda i, j: (0, 0)),     # gamma
                pl.BlockSpec((1, D), lambda i, j: (0, 0)),     # beta
                pl.BlockSpec((D, tn), lambda i, j: (0, j)),    # W column tile
                pl.BlockSpec((1, tn), lambda i, j: (0, j)),    # bias tile
            ],
            out_specs=pl.BlockSpec((tm, tn), lambda i, j: (i, j)),
            scratch_shapes=[pltpu.VMEM((tm, D), w.dtype)],     # cached LN rows
        ),
        compiler_params=pltpu.CompilerParams(
            # j must run in order (j==0 fills the LN scratch) -> "arbitrary";
            # row tiles are independent -> "parallel" (megacore sharding).
            dimension_semantics=("parallel", "arbitrary"),
            vmem_limit_bytes=vmem_limit,
        ),
        cost_estimate=cost,
    )(x2, gamma2, beta2, w, b2)

    return out2.reshape(B, N, D_out)


def prenorm_linear_ref(x, gamma, beta, w, b):
    xf = x.astype(jnp.float32)
    mean = jnp.mean(xf, axis=-1, keepdims=True)
    var = jnp.mean((xf - mean) ** 2, axis=-1, keepdims=True)
    xn = (xf - mean) * jax.lax.rsqrt(var + EPS)
    y = xn * gamma.astype(jnp.float32) + beta.astype(jnp.float32)
    out = jnp.dot(y.astype(w.dtype), w, preferred_element_type=jnp.float32)
    out = out + b.astype(jnp.float32)
    return out.astype(x.dtype)


if __name__ == "__main__":
    B, N, D = 2, 8, 32            # batch, tokens, feature dim (LayerNorm dim)
    D_out = D                     # fn = Linear(D, D)

    key = jax.random.PRNGKey(0)
    kx, kg, kb, kw, kbias = jax.random.split(key, 5)

    x = jax.random.normal(kx, (B, N, D), dtype=jnp.float32)
    # LayerNorm affine params (f32) + Linear weights in bf16 (MXU-native).
    gamma = 1.0 + 0.02 * jax.random.normal(kg, (D,), dtype=jnp.float32)
    beta = 0.02 * jax.random.normal(kb, (D,), dtype=jnp.float32)
    w = (jax.random.normal(kw, (D, D_out), dtype=jnp.float32)
         / jnp.sqrt(D)).astype(jnp.bfloat16)
    b = (0.02 * jax.random.normal(kbias, (D_out,), dtype=jnp.float32)
         ).astype(jnp.bfloat16)

    out = prenorm_linear(x, gamma, beta, w, b)
    out = jax.block_until_ready(out)

    ref = prenorm_linear_ref(x, gamma, beta, w, b)
    assert out.shape == (B, N, D_out)
    assert jnp.allclose(out, ref, rtol=2e-2, atol=2e-2), (
        float(jnp.max(jnp.abs(out - ref))))

    print("KERNEL_OK")
</pallas_src>

<mosaic_0001>
module attributes {stable_mosaic.version = 11 : i64} {
  func.func @prenorm_linear_kernel(%arg0: i32, %arg1: i32, %arg2: memref<8x32xf32, #tpu.memory_space<vmem>>, %arg3: memref<1x32xf32, #tpu.memory_space<vmem>>, %arg4: memref<1x32xf32, #tpu.memory_space<vmem>>, %arg5: memref<32x32xbf16, #tpu.memory_space<vmem>>, %arg6: memref<1x32xbf16, #tpu.memory_space<vmem>>, %arg7: memref<8x32xf32, #tpu.memory_space<vmem>>, %arg8: memref<8x32xbf16, #tpu.memory_space<vmem>>) attributes {dimension_semantics = [#tpu.dimension_semantics<parallel>, #tpu.dimension_semantics<arbitrary>], iteration_bounds = array<i64: 2, 1>, scalar_prefetch = 0 : i64, scratch_operands = 1 : i64, tpu.core_type = #tpu.core_type<tc>, window_params = [{transform_indices = @transform_0, window_bounds = array<i64: 8, 32>}, {pipeline_mode = #tpu.pipeline_mode<synchronous>, transform_indices = @transform_1, window_bounds = array<i64: 1, 32>}, {pipeline_mode = #tpu.pipeline_mode<synchronous>, transform_indices = @transform_2, window_bounds = array<i64: 1, 32>}, {transform_indices = @transform_3, window_bounds = array<i64: 32, 32>}, {transform_indices = @transform_4, window_bounds = array<i64: 1, 32>}, {transform_indices = @transform_5, window_bounds = array<i64: 8, 32>}]} {
    %c0_i32 = arith.constant 0 : i32
    %0 = arith.cmpi eq, %arg1, %c0_i32 : i32
    %1 = arith.extui %0 : i1 to i32
    %c0_i32_0 = arith.constant 0 : i32
    %2 = arith.cmpi ne, %1, %c0_i32_0 : i32
    scf.if %2 {
      %c0_8 = arith.constant 0 : index
      %c0_9 = arith.constant 0 : index
      %11 = vector.load %arg2[%c0_8, %c0_9] : memref<8x32xf32, #tpu.memory_space<vmem>>, vector<8x32xf32>
      %cst_10 = arith.constant dense<0.000000e+00> : vector<8xf32>
      %12 = vector.multi_reduction <add>, %11, %cst_10 [1] : vector<8x32xf32> to vector<8xf32>
      %13 = vector.shape_cast %12 : vector<8xf32> to vector<8x1xf32>
      %cst_11 = arith.constant 3.200000e+01 : f32
      %14 = vector.broadcast %cst_11 : f32 to vector<8x1xf32>
      %15 = arith.divf %13, %14 : vector<8x1xf32>
      %16 = vector.broadcast %15 : vector<8x1xf32> to vector<8x32xf32>
      %17 = arith.subf %11, %16 : vector<8x32xf32>
      %18 = arith.mulf %17, %17 : vector<8x32xf32>
      %cst_12 = arith.constant dense<0.000000e+00> : vector<8xf32>
      %19 = vector.multi_reduction <add>, %18, %cst_12 [1] : vector<8x32xf32> to vector<8xf32>
      %20 = vector.shape_cast %19 : vector<8xf32> to vector<8x1xf32>
      %cst_13 = arith.constant 3.200000e+01 : f32
      %21 = vector.broadcast %cst_13 : f32 to vector<8x1xf32>
      %22 = arith.divf %20, %21 : vector<8x1xf32>
      %cst_14 = arith.constant 9.99999974E-6 : f32
      %23 = vector.broadcast %cst_14 : f32 to vector<8x1xf32>
      %24 = arith.addf %22, %23 : vector<8x1xf32>
      %25 = math.rsqrt %24 : vector<8x1xf32>
      %26 = vector.broadcast %25 : vector<8x1xf32> to vector<8x32xf32>
      %27 = arith.mulf %17, %26 : vector<8x32xf32>
      %c0_15 = arith.constant 0 : index
      %c0_16 = arith.constant 0 : index
      %28 = vector.load %arg3[%c0_15, %c0_16] : memref<1x32xf32, #tpu.memory_space<vmem>>, vector<1x32xf32>
      %29 = vector.broadcast %28 : vector<1x32xf32> to vector<8x32xf32>
      %30 = arith.mulf %27, %29 : vector<8x32xf32>
      %c0_17 = arith.constant 0 : index
      %c0_18 = arith.constant 0 : index
      %31 = vector.load %arg4[%c0_17, %c0_18] : memref<1x32xf32, #tpu.memory_space<vmem>>, vector<1x32xf32>
      %32 = vector.broadcast %31 : vector<1x32xf32> to vector<8x32xf32>
      %33 = arith.addf %30, %32 : vector<8x32xf32>
      %34 = arith.truncf %33 : vector<8x32xf32> to vector<8x32xbf16>
      %c0_19 = arith.constant 0 : index
      %c0_20 = arith.constant 0 : index
      %35 = vector.load %arg8[%c0_19, %c0_20] : memref<8x32xbf16, #tpu.memory_space<vmem>>, vector<8x32xbf16>
      tpu.vector_store %arg8[%c0_19, %c0_20], %34 {strides = array<i32>} : memref<8x32xbf16, #tpu.memory_space<vmem>>, vector<8x32xbf16>,
    } else {
    }
    %c0 = arith.constant 0 : index
    %c0_1 = arith.constant 0 : index
    %3 = vector.load %arg8[%c0, %c0_1] : memref<8x32xbf16, #tpu.memory_space<vmem>>, vector<8x32xbf16>
    %c0_2 = arith.constant 0 : index
    %c0_3 = arith.constant 0 : index
    %4 = vector.load %arg5[%c0_2, %c0_3] : memref<32x32xbf16, #tpu.memory_space<vmem>>, vector<32x32xbf16>
    %cst = arith.constant dense<0.000000e+00> : vector<8x32xf32>
    %5 = tpu.matmul %3, %4, %cst {dimension_numbers = #tpu.dot_dimension_numbers<[1], [0], [0], [1], [0, 0, 1, 1], [], []>} : vector<8x32xbf16>, vector<32x32xbf16>, vector<8x32xf32> -> vector<8x32xf32>
    %c0_4 = arith.constant 0 : index
    %c0_5 = arith.constant 0 : index
    %6 = vector.load %arg6[%c0_4, %c0_5] : memref<1x32xbf16, #tpu.memory_space<vmem>>, vector<1x32xbf16>
    %7 = arith.extf %6 : vector<1x32xbf16> to vector<1x32xf32>
    %8 = vector.broadcast %7 : vector<1x32xf32> to vector<8x32xf32>
    %9 = arith.addf %5, %8 : vector<8x32xf32>
    %c0_6 = arith.constant 0 : index
    %c0_7 = arith.constant 0 : index
    %10 = vector.load %arg7[%c0_6, %c0_7] : memref<8x32xf32, #tpu.memory_space<vmem>>, vector<8x32xf32>
    tpu.vector_store %arg7[%c0_6, %c0_7], %9 {strides = array<i32>} : memref<8x32xf32, #tpu.memory_space<vmem>>, vector<8x32xf32>,
    return
  }
  func.func @transform_0(%arg0: i32, %arg1: i32) -> (i32, i32) {
    %c0_i32 = arith.constant 0 : i32
    %c0_i32_0 = arith.constant 0 : i32
    return %arg0, %c0_i32 : i32, i32
  }
  func.func @transform_1(%arg0: i32, %arg1: i32) -> (i32, i32) {
    %c0_i32 = arith.constant 0 : i32
    %c0_i32_0 = arith.constant 0 : i32
    %c0_i32_1 = arith.constant 0 : i32
    return %c0_i32, %c0_i32_0 : i32, i32
  }
  func.func @transform_2(%arg0: i32, %arg1: i32) -> (i32, i32) {
    %c0_i32 = arith.constant 0 : i32
    %c0_i32_0 = arith.constant 0 : i32
    %c0_i32_1 = arith.constant 0 : i32
    return %c0_i32, %c0_i32_0 : i32, i32
  }
  func.func @transform_3(%arg0: i32, %arg1: i32) -> (i32, i32) {
    %c0_i32 = arith.constant 0 : i32
    %c0_i32_0 = arith.constant 0 : i32
    return %c0_i32, %arg1 : i32, i32
  }
  func.func @transform_4(%arg0: i32, %arg1: i32) -> (i32, i32) {
    %c0_i32 = arith.constant 0 : i32
    %c0_i32_0 = arith.constant 0 : i32
    return %c0_i32, %arg1 : i32, i32
  }
  func.func @transform_5(%arg0: i32, %arg1: i32) -> (i32, i32) {
    %c0_i32 = arith.constant 0 : i32
    return %arg0, %arg1 : i32, i32
  }
}

</mosaic_0001>

<bundles_post_ra>
// kernel: tpu_custom_call.1
= control target key start
LH: loop header
LB: loop body
LE: loop exit
PB: predicated region body
PF: predicated region fallthrough
CT: control target
= control target key end

     0   :  { %10 = vsyncpa [#allocation4], 0  ;;  %s1043_s0 = inlined_call_operand.hbm [shape: f32[16,32], index: 0, kind: input, shape index: {}]   ;;  %s1044_s1 = inlined_call_operand.vmem [shape: f32[1,32], index: 1, kind: input, shape index: {}]   ;;  %s1045_s2 = inlined_call_operand.vmem [shape: f32[1,32], index: 2, kind: input, shape index: {}]   ;;  %s1046_s3 = inlined_call_operand.hbm [shape: bf16[32,32], index: 3, kind: input, shape index: {}]   ;;  %s1047_s4 = inlined_call_operand.vmem [shape: bf16[1,32], index: 4, kind: input, shape index: {}]   ;;  %s1048_s5 = inlined_call_operand.hbm [shape: f32[16,32], index: 5, kind: output, shape index: {}]  }
   0x1   :  { %12 = vsyncpa [#allocation4 + $0x1], 0 }
   0x2   :  { %13 = vsyncpa [#allocation7], 0 }
   0x3   :  { %14 = vsyncpa [#allocation5], 0 }
   0x4   :  { %16 = vsyncpa [#allocation5 + $0x1], 0  ;;  %s812_s18 = smov 0   ;;  %s814_s19 = smov 0  }
   0x5   :  { %s816_s20 = smov 0   ;;  %s818_s21 = smov 0  }
   0x6   :  { %s820_s22 = smov 0   ;;  %s822_s23 = smov 0  }
   0x7 LB: > { %s516_s24 = sadd.s32 4294967295, %s773_s23   ;;  %s517_s25 = sadd.s32 4294967294, %s773_s23   ;;  %s773_s23 = sphi %s822_s23, %s22_s23   ;;  %s769_s22 = sphi %s820_s22, %s1072_s22   ;;  %s765_s21 = sphi %s818_s21, %s1071_s21   ;;  %s761_s20 = sphi %s816_s20, %s1070_s20   ;;  %s757_s19 = sphi %s814_s19, %s1069_s19   ;;  %s753_s18 = sphi %s812_s18, %s1068_s18  }
   0x8   : > { %p54_p0 = scmp.ne.s32.totalorder %s757_s19, %s753_s18  ;;  %p846_p1 = scmp.eq.s32.totalorder %s516_s24, 0 }
   0x9   : > { %p850_p2 = scmp.eq.s32.totalorder %s516_s24, 1  ;;  %p180_p3 = scmp.eq.s32.totalorder %s517_s25, 1 }
   0xa   : > { %s1053_s26 = scalar_select %p846_p1, 1, 0 }
   0xb   : > { %s1054_s27 = scalar_select %p850_p2, 1, 0 }
   0xc   : > { %p856_p4 = por %p846_p1, %p54_p0  ;;  %p518_p5 = scmp.ge.s32.totalorder %s773_s23, 1 }
   0xd   : > { %p861_p6 = por %p180_p3, %p54_p0  ;;  %p187_p7 = scmp.lt.s32.totalorder %s773_s23, 3 }
   0xe   : > { %s1055_s28 = scalar_select %p856_p4, 1, 0 }
   0xf   : > { %s1056_s29 = scalar_select %p861_p6, 1, 0 }
  0x10   : > { %p866_p8 = pnand %p518_p5, %p187_p7  ;;  %s775_s6 = smov [#allocation6]  }
  0x11   : > { %s207_s7 = sshll.u32 %s775_s6, 4  ;;  %s34_s9 = sadd.s32 1, %s769_s22  ;;  %s208_s7 = int_to_ptr.vmem [resolvable:$true] %s207_s7 }
  0x12   : > { %s1057_s30 = scalar_select %p866_p8, 1, 0 }
  0x13   : > { %p556_p9 = pneg %p866_p8  ;;  %s629_s12 = scalar_lea.hbm %s1046_s3, 256 }
  0x14   : > { %p630_p12 = scmp.ne.s32.totalorder %s1046_s3, %s629_s12  ;;  %p636_p5 = scmp.lt.u32.totalorder %s629_s12, %s1046_s3 }
  0x15   : > { %p875_p11 = pnand %p556_p9, %p846_p1 }
  0x17   : > { %p631_p13 = pneg %p875_p11 }
  0x19   : > { %p632_p0 = pnand %p631_p13, %p630_p12 }
  0x1b   : > { %p633_p3 = pneg %p632_p0 }
  0x1d   : > { %p638_p7 = pnand %p636_p5, %p633_p3 }
  0x1f   : > { %641 = shalt.err (!%p638_p7)
}
  0x20   : > { %s642_s17 = scalar_lea.vmem %s208_s7, 256  ;;  %p650_p1 = scmp.lt.s32.totalorder %s208_s7, %s208_s7 }
  0x21   : > { %p643_p9 = scmp.ne.s32.totalorder %s208_s7, %s642_s17  ;;  %p651_p4 = scmp.lt.s32.totalorder %s642_s17, %s642_s17 }
  0x23   : > { %p645_p10 = pnand %p643_p9, %p631_p13  ;;  %p652_p8 = por %p651_p4, %p650_p1 }
  0x25   : > { %p646_p6 = pneg %p645_p10 }
  0x27   : > { %p653_p2 = pnand %p652_p8, %p646_p6 }
  0x29   : > { %656 = shalt.err (!%p653_p2)
}
  0x2a   : > { %s776_s24 = smov 64   ;;  %s777_s25 = smov 4  }
  0x2b   : > { %559 = dma.hbm_to_vmem [thread:$0]  (!%p875_p11), %s1046_s3, 256, %s208_s7, [#allocation7], %s776_s24, %s776_s24, %s777_s25  }
  0x2c   : > { %p36_p1 = scmp.ge.s32.totalorder %s34_s9, 2  ;;  %s41_s11 = sadd.s32 1, %s761_s20 }
  0x2d   : > { %p48_p2 = scmp.ne.s32.totalorder %s761_s20, %s757_s19  ;;  %p49_p4 = scmp.eq.s32.totalorder %s773_s23, 0 }
  0x2e   : > { %s1074_s9 = smov (%p36_p1, %s34_s9), 0  ;;  %p1060_p8 = scmp.ne.s32.totalorder %s1054_s27, 0 }
  0x2f   : > { %p902_p6 = por %p49_p4, %p48_p2  ;;  %s38_s8 = ssub.s32 %s769_s22, %s1074_s9 }
  0x30   : > { %p908_p10 = por %p1060_p8, %p48_p2  ;;  %p569_p12 = scmp.lt.s32.totalorder %s773_s23, 2 }
  0x31   : > { %p39_p11 = scmp.eq.s32.totalorder %s38_s8, 0  ;;  %s227_s7 = sand.u32 1, %s761_s20  }
  0x32   : > { %s522_s14 = sshll.u32 %s227_s7, 3  ;;  %s523_s16 = sshll.u32 %s769_s22, 7 }
  0x33   : > { %s917_s15 = scalar_select %p39_p11, %s761_s20, %s41_s11  }
  0x34   : > { %s923_s25 = scalar_lea.hbm %s1043_s0, %s523_s16  ;;  %s231_s27 = scalar_lea.vmem [#allocation3], %s522_s14 }
  0x35   : > { %s238_s6 = sshll.u32 %s231_s27, 4  ;;  %p929_p13 = pnand %p569_p12, %p902_p6  ;;  %s925_s6 = int_to_ptr.vmem [resolvable:$true] %s238_s6 }
  0x36   : > { %s228_s11 = scalar_lea.sflag [#allocation4], %s227_s7  ;;  %s657_s8 = scalar_lea.hbm %s923_s25, 128 }
  0x37   : > { %p658_p0 = scmp.ne.s32.totalorder %s923_s25, %s657_s8  ;;  %p659_p3 = pneg %p929_p13 }
  0x38   : > { %s662_s17 = scalar_lea.hbm %s1043_s0, 256  ;;  %p663_p9 = scmp.lt.u32.totalorder %s923_s25, %s1043_s0 }
  0x39   : > { %p660_p5 = pnand %p659_p3, %p658_p0  ;;  %p664_p1 = scmp.lt.u32.totalorder %s662_s17, %s657_s8 }
  0x3a   : > { %p666_p4 = scmp.lt.u32.totalorder %s657_s8, %s923_s25 }
  0x3b   : > { %p661_p7 = pneg %p660_p5  ;;  %p665_p2 = por %p664_p1, %p663_p9 }
  0x3d   : > { %p667_p6 = por %p666_p4, %p665_p2 }
  0x3f   : > { %p668_p8 = pnand %p667_p6, %p661_p7 }
  0x41   : > { %671 = shalt.err (!%p668_p8)
}
  0x42   : > { %s672_s7 = scalar_lea.vmem %s925_s6, 128  ;;  %s778_s27 = smov [#allocation3]  }
  0x43   : > { %p673_p12 = scmp.ne.s32.totalorder %s925_s6, %s672_s7  ;;  %s677_s14 = sshll.u32 %s778_s27, 4  ;;  %s678_s14 = int_to_ptr.vmem [resolvable:$false] %s677_s14 }
  0x44   : > { %s679_s16 = scalar_lea.vmem %s678_s14, 256  ;;  %p680_p5 = scmp.lt.s32.totalorder %s925_s6, %s678_s14 }
  0x45   : > { %p675_p11 = pnand %p673_p12, %p659_p3  ;;  %p681_p9 = scmp.lt.s32.totalorder %s679_s16, %s672_s7 }
  0x47   : > { %p676_p0 = pneg %p675_p11  ;;  %p682_p1 = por %p681_p9, %p680_p5 }
  0x49   : > { %p683_p2 = pnand %p682_p1, %p676_p0 }
  0x4b   : > { %686 = shalt.err (!%p683_p2)
}
  0x4c   : > { %563 = dma.hbm_to_vmem [thread:$0]  (!%p929_p13), %s923_s25, 128, %s925_s6, %s228_s11  }
  0x4d   : > { %p1063_p7 = scmp.ne.s32.totalorder %s1057_s30, 0 }
  0x4e   : > { %s961_s8 = sand.u32 (!%p1063_p7), 1, %s757_s19   ;;  %p1064_p3 = scmp.ne.s32.totalorder (!%p1063_p7), %s1055_s28, 0 }
  0x4f   : > { %247 = sbr.rel (%p1063_p7) target bundleno = 642 (0x282), region = 40  ;;  %s525_s17 = sshll.u32 (!%p1063_p7), %s961_s8, 3 }
  0x50   : > { %s250_s12 = scalar_lea.sflag (!%p1063_p7), [#allocation4], %s961_s8  ;;  %s253_s24 = scalar_lea.vmem (!%p1063_p7), [#allocation3], %s525_s17 }
  0x56   : > { %740 = dma.done.wait (%p1064_p3), %s250_s12, 128  }
  0x57   : > { %742 = vsyncadd (%p1064_p3), %s250_s12, 4294967168  ;;  %p1065_p13 = scmp.ne.s32.totalorder %s1053_s26, 0 }
  0x59   : > { %744 = dma.done.wait (%p1065_p13), [#allocation7], 256  }
  0x5a   : > { %746 = vsyncadd (%p1065_p13), [#allocation7], 4294967040  ;;  %vm296_vm0 = vcmask 261120   ;;  %v295_v0 = vld [vmem:[%s253_s24] sm:$0xff]  ;;  %v625_v7 = vld [vmem:[#allocation6] sm:$0xff]   ;;  %v779_v8 = vmov 0.0   ;;  %v337_v21 = vlaneseq }
  0x5b   : > { %v297_v1 = vsel %vm296_vm0, %v295_v0, 0.0  ;;  %540 = vmatprep.subr.bf16.mxu0 %v779_v8  ;;  %v626_v9 = vld [vmem:[#allocation6 + $0x8] sm:$0xff]   ;;  %vm780_vm1 = vmmov 0   ;;  %vm328_vm2 = vcmask 257024   ;;  %s534_s11 = sshll.u32 %s765_s21, 7  ;;  %s286_s7 = scalar_lea.vmem [#allocation8], %s525_s17 }
  0x5c   : > { %298 = vadd.xlane.f32.xlu0 %v297_v1  ;;  %541 = vmatpush3.bf16.msra.mxu0 %v625_v7  ;;  %v528_v14 = vld [vmem:[%s1044_s1] ss:$0 sm:$0xff]  ;;  %v338_v22 = vshrl.u32 %v337_v21, 7  ;;  %s413_s27 = sshll.u32 %s286_s7, 4  ;;  %s993_s12 = scalar_lea.hbm %s1048_s5, %s534_s11  ;;  %s995_s27 = int_to_ptr.vmem [resolvable:$true] %s413_s27 }
  0x5d   : > { %544 = vmatprep.mubr.msk.bf16.mxu0 %vm780_vm1, %v779_v8  ;;  %542 = vmatprep.subr.bf16.mxu0 %v779_v8  ;;  %v529_v16 = vld [vmem:[%s1045_s2] ss:$0 sm:$0xff]  ;;  %s399_s21 = scalar_lea.sflag [#allocation5], %s961_s8  ;;  %s687_s17 = scalar_lea.vmem %s995_s27, 128 }
  0x5e   : > { %v335_v23 = vld [vmem:[%s1047_s4] sm:$0x1]  ;;  %v339_v25 = vsub.s32 0, %v338_v22  ;;  %p688_p4 = scmp.ne.s32.totalorder %s995_s27, %s687_s17  ;;  %s781_s24 = smov [#allocation8]  }
  0x5f   : > { %v336_v24 = vunpack.c.l.bf16 %v335_v23  ;;  %s691_s26 = sshll.u32 %s781_s24, 4  ;;  %s692_s26 = int_to_ptr.vmem [resolvable:$false] %s691_s26 }
  0x60   : > { %543 = vmatpush3.bf16.msra.mxu0 %v626_v9  ;;  %p689_p6 = pnand %p688_p4, %p908_p10  ;;  %s693_s28 = scalar_lea.vmem %s692_s26, 256 }
  0x61   : > { %v340_v26 = vrot.slane %v336_v24, %v339_v25  ;;  %p694_p12 = scmp.lt.s32.totalorder %s995_s27, %s692_s26  ;;  %p695_p11 = scmp.lt.s32.totalorder %s693_s28, %s687_s17 }
  0x62   : > { %p690_p8 = pneg %p689_p6 }
  0x63   : > { %p696_p0 = por %p695_p11, %p694_p12 }
  0x65   : > { %p697_p5 = pnand %p696_p0, %p690_p8 }
  0xe9   : > { %v299_v2 = vpop.xlane.xlu0 %298 }
  0xea   : > { %v301_v3 = vmul.f32 0.03125, %v299_v2 }
  0xec   : > { %v302_v4 = vsub.f32 %v295_v0, %v301_v3 }
  0xee   : > { %v303_v5 = vmul.f32 %v302_v4, %v302_v4 }
  0xf0   : > { %v304_v6 = vsel %vm296_vm0, %v303_v5, 0.0 }
  0xf1   : > { %305 = vadd.xlane.f32.xlu0 %v304_v6 }
 0x17e   : > { %v306_v10 = vpop.xlane.xlu0 %305 }
 0x17f   : > { %v307_v11 = vmul.f32 0.03125, %v306_v10 }
 0x181   : > { %v308_v12 = vadd.f32 1e-05, %v307_v11 }
 0x183   : > { %627 = vrsqrt.f32 %v308_v12 }
 0x18d   : > { %v628_v13 = vpop.eup %627 }
 0x18e   : > { %v310_v15 = vmul.f32 %v628_v13, %v302_v4 }
 0x190   : > { %v318_v17 = vmul.f32 %v528_v14, %v310_v15 }
 0x192   : > { %v326_v18 = vadd.f32 %v529_v16, %v318_v17 }
 0x194   : > { %v327_v19 = vpack.c.bf16 %v326_v18, %v326_v18 }
 0x196   : > { %329 = vst.msk [vmem:[#allocation2] sm:$0xf] %vm328_vm2, %v327_v19 }
 0x19d   : > { %v330_v20 = vld [vmem:[#allocation2] sm:$0xf] }
 0x19e   : > { %545 = vmatmul.mubr.msk.bf16.vlgmr.msra.gmra.mrb[0].mxu0 %vm296_vm0, %v330_v20 }
 0x271   : > { %v391_v27 = vpop.f32.mrb[0].mxu0 }
 0x272   : > { %v392_v28 = vadd.f32 %v391_v27, %v340_v26  ;;  %v546_v29 = vpop.f32.mrb[1].mxu0 }
 0x273   : > { %v394_v30 = vpop.f32.mrb[2].mxu0 }
 0x274   : > { %v547_v31 = vpop.f32.mrb[3].mxu0  ;;  %397 = vst.msk [vmem:[%s286_s7] sm:$0xff] %vm296_vm0, %v392_v28 }
 0x275   : > { %700 = shalt.err (!%p697_p5)
}
 0x276   : > { %s701_s8 = scalar_lea.hbm %s993_s12, 128  ;;  %s705_s6 = scalar_lea.hbm %s1048_s5, 256 }
 0x277   : > { %p702_p9 = scmp.ne.s32.totalorder %s993_s12, %s701_s8  ;;  %p706_p7 = scmp.lt.u32.totalorder %s993_s12, %s1048_s5 }
 0x278   : > { %p707_p3 = scmp.lt.u32.totalorder %s705_s6, %s701_s8  ;;  %p709_p4 = scmp.lt.u32.totalorder %s701_s8, %s993_s12 }
 0x279   : > { %p703_p1 = pnand %p702_p9, %p908_p10 }
 0x27a   : > { %p708_p13 = por %p707_p3, %p706_p7 }
 0x27b   : > { %p704_p2 = pneg %p703_p1 }
 0x27c   : > { %p710_p6 = por %p709_p4, %p708_p13 }
 0x27e   : > { %p711_p8 = pnand %p710_p6, %p704_p2 }
 0x280   : > { %714 = shalt.err (!%p711_p8)
}
 0x281   : > { %554 = dma.vmem_to_hbm [thread:$0]  (%p908_p10), %s995_s27, 128, %s993_s12, %s399_s21  }
 0x282 PF: > { %s425_s7 = sand.u32 1, %s753_s18   ;;  %p1066_p12 = scmp.ne.s32.totalorder %s1056_s29, 0 }
 0x283   : > { %p1067_p11 = scmp.ge.s32.totalorder %s773_s23, 2  ;;  %s426_s14 = scalar_lea.sflag [#allocation5], %s425_s7 }
 0x285   : > { %p565_p0 = pnand %p1067_p11, %p1066_p12 }
 0x287   : > { %748 = dma.done.wait (!%p565_p0), %s426_s14, 128  }
 0x288   : > { %750 = vsyncadd (!%p565_p0), %s426_s14, 4294967168  ;;  %s22_s23 = sadd.s32 1, %s773_s23   ;;  %s1068_s18 = smov %s757_s19 }
 0x289   : > { %p19_p5 = scmp.ge.s32.totalorder %s22_s23, 4   ;;  %s1069_s19 = smov %s761_s20 }
 0x28a   : > { %s1070_s20 = smov %s917_s15  ;;  %s1071_s21 = smov %s769_s22 }
 0x28b   : > { %s1072_s22 = smov %s1074_s9  ;;  %21 = sbr.rel (!%p19_p5) target bundleno = 7 (0x7), region = 97 }
 0x292   :  { %431 = vsyncpa [#allocation4], 1 }
 0x293   :  { %433 = vsyncpa [#allocation4 + $0x1], 1 }
 0x294   :  { %434 = vsyncpa [#allocation7], 1 }
 0x295   :  { %435 = vsyncpa [#allocation5], 1 }
 0x296   :  { %437 = vsyncpa [#allocation5 + $0x1], 1 }

</bundles_post_ra>
